<compile_context>
chip_gen: v6e
topology: v6e:2x2x1
jax: 0.10.0
libtpu: 0.0.40
codegen_flags: <defaults>
</compile_context>

<pallas_src>
import jax
import jax.numpy as jnp
from jax import lax
from jax.experimental import pallas as pl
from jax.experimental.pallas import tpu as pltpu

EPS = 1e-5
NEG_SLOPE = 0.2


# ----------------------------- Pallas kernels -----------------------------

def _gram_partial_kernel(x_ref, g_ref, s_ref):
    """Per-tile stats partials: G_i = X_i^T X_i (Cin, Cin), s_i = colsum(X_i) (1, Cin).

    The tile is fed to the MXU in its native (bf16) dtype with f32 accumulation, so the
    derived BN statistics are consistent with the quantized inputs the fused pass sees.
    Emitting per-tile partials keeps this pass fully 'parallel' (both TensorCores on v7x)
    and the cross-tile reduction happens pairwise in f32 in the glue.
    """
    x = x_ref[...]
    g_ref[...] = lax.dot_general(
        x, x, dimension_numbers=(((0,), (0,)), ((), ())),
        preferred_element_type=jnp.float32)[None]
    s_ref[...] = jnp.sum(x, axis=0, keepdims=True, dtype=jnp.float32)[None]


def _fused_deconv_bn_lrelu_kernel(x_ref, w_ref, a_ref, c_ref, o_ref):
    """Fused hot path: (tm, Cin) @ (Cin, C4) on the MXU (f32 accumulation), precomputed
    BN affine (conv bias folded into the shift), LeakyReLU(0.2), and an in-kernel (kh)
    de-interleave so the final NHWC activation is produced directly.

    o_ref block is (R, kH, W, kW*Cout): tile row r*W + w is input pixel (row_base+r, w);
    lane slab kh of z holds output row 2*(row_base+r)+kh.
    """
    R, kH, W, KWC = o_ref.shape
    z = jnp.dot(x_ref[...], w_ref[...], preferred_element_type=jnp.float32)
    z = z * a_ref[...] + c_ref[...]
    z = jnp.where(z >= 0, z, NEG_SLOPE * z)
    for kh in range(kH):                                   # static unroll (kH == 2)
        slab = z[:, kh * KWC:(kh + 1) * KWC]               # static 128-aligned lane slice
        o_ref[:, kh, :, :] = slab.reshape(R, W, KWC).astype(o_ref.dtype)


# ------------------------------- Tiling helpers ----------------------------

def _divisors(n):
    ds = []
    d = 1
    while d * d <= n:
        if n % d == 0:
            ds.append(d)
            if d != n // d:
                ds.append(n // d)
        d += 1
    return sorted(ds)


def _choose_rows_per_tile(NH, W, Cin, C4, cbytes, obytes, tm_target, vmem_budget):
    """Pick R = image pixel-rows per tile: R | NH, R*W <= tm_target, VMEM footprint fits,
    and (when possible) at least 2 grid steps so both v7x TensorCores get work."""
    def footprint(r):
        tm = r * W
        return (2 * tm * Cin * cbytes        # double-buffered x tiles
                + Cin * C4 * cbytes          # resident weight (single buffer)
                + 2 * C4 * 4                 # BN scale / shift
                + tm * C4 * 4                # f32 matmul result (internal scratch)
                + 2 * tm * C4 * obytes)      # double-buffered de-interleaved output tiles
    ds = _divisors(NH)
    best = 1
    for d in ds:
        if d * W <= tm_target and footprint(d) <= vmem_budget:
            best = max(best, d)
    if best == NH and NH >= 2:               # guarantee >= 2 grid steps (v7x megacore)
        best = max(d for d in ds if d < NH)
    return best, footprint(best)


# ------------------------------- Wrappers ---------------------------------

def deconv_block_nhwc(x_nhwc, weight, bias, gamma, beta, *, tm=1024,
                      compute_dtype=jnp.bfloat16, out_dtype=None):
    """NHWC-native DeconvBlock forward (chain consecutive blocks in NHWC/bf16; convert to
    NCHW / f32 only at model boundaries).

    x_nhwc: (N, H, W, Cin); weight: (Cin, Cout, kH, kW) (PyTorch ConvTranspose2d layout).
    Returns (N, H*kH, W*kW, Cout) in `out_dtype` (defaults to compute_dtype).
    """
    if out_dtype is None:
        out_dtype = compute_dtype
    N, H, W, Cin = x_nhwc.shape
    assert weight.shape[0] == Cin
    Cout, kH, kW = weight.shape[1], weight.shape[2], weight.shape[3]
    NH = N * H
    M = NH * W
    C4 = kH * kW * Cout
    KWC = kW * Cout

    # --- glue: flatten rows, quantize x / W once to the MXU input dtype ---
    x_flat = x_nhwc.reshape(M, Cin).astype(compute_dtype)
    w_mat = jnp.transpose(weight, (0, 2, 3, 1)).reshape(Cin, C4).astype(compute_dtype)
    w32 = w_mat.astype(jnp.float32)                               # stats use the quantized W
    b4 = jnp.tile(bias.astype(jnp.float32), kH * kW)[None, :]     # (1, C4)

    # --- tiling: whole pixel-rows per tile, R | N*H -> no padding, no masking, no slice ---
    cbytes = jnp.dtype(compute_dtype).itemsize
    obytes = jnp.dtype(out_dtype).itemsize
    try:
        vmem_cap = int(pltpu.get_tpu_info().vmem_capacity_bytes)
    except Exception:
        vmem_cap = 64 * 1024 * 1024
    vmem_usable = (vmem_cap * 3) // 4          # headroom: <=48 MiB on v7x, <=96 MiB v5e/v6e
    R, fp = _choose_rows_per_tile(NH, W, Cin, C4, cbytes, obytes,
                                  tm_target=tm, vmem_budget=vmem_usable)
    tm_eff = R * W
    n_tiles = NH // R
    grid = (n_tiles,)

    # --- pass 1 (tiny, fully parallel): per-tile Gram + column-sum partials of x ---
    g_parts, s_parts = pl.pallas_call(
        _gram_partial_kernel,
        out_shape=(jax.ShapeDtypeStruct((n_tiles, Cin, Cin), jnp.float32),
                   jax.ShapeDtypeStruct((n_tiles, 1, Cin), jnp.float32)),
        grid_spec=pltpu.PrefetchScalarGridSpec(
            num_scalar_prefetch=0,
            grid=grid,
            in_specs=[pl.BlockSpec((tm_eff, Cin), lambda i: (i, 0))],
            out_specs=(pl.BlockSpec((1, Cin, Cin), lambda i: (i, 0, 0)),
                       pl.BlockSpec((1, 1, Cin), lambda i: (i, 0, 0)))),
        compiler_params=pltpu.CompilerParams(dimension_semantics=("parallel",)),
    )(x_flat)
    G = jnp.sum(g_parts, axis=0)               # (Cin, Cin), pairwise f32 reduce
    sx = jnp.sum(s_parts, axis=0)               # (1, Cin)

    # --- tiny f32 glue: analytic BN scale / shift (training-mode biased batch variance) ---
    Mf = float(M)
    Gc = G - (sx.T @ sx) / Mf                                        # centered Gram
    mu_col = (sx @ w32) / Mf + b4                                    # (1, C4) per-column mean
    var_col = jnp.sum(w32 * (Gc @ w32), axis=0, keepdims=True) / Mf  # (1, C4) per-column var
    mu_g = mu_col.reshape(kH * kW, Cout)
    var_g = var_col.reshape(kH * kW, Cout)
    mean_c = jnp.mean(mu_g, axis=0)                                  # (Cout,)
    var_c = jnp.mean(var_g + (mu_g - mean_c) ** 2, axis=0)           # law of total variance
    var_c = jnp.maximum(var_c, 0.0)                                  # f32-rounding guard
    inv = gamma.astype(jnp.float32) * lax.rsqrt(var_c + EPS)
    scale = jnp.tile(inv, kH * kW)[None, :]                          # (1, C4)
    shift = jnp.tile(beta.astype(jnp.float32) - mean_c * inv, kH * kW)[None, :]
    shift = b4 * scale + shift                                       # fold conv bias in

    # --- pass 2 (heavy, fully parallel): matmul + BN affine + LeakyReLU + de-interleave ---
    vmem_limit = int(min(vmem_usable, max(16 * 1024 * 1024, fp + (fp >> 1))))

    def _resident(shape):
        idx = lambda i: (0,) * len(shape)
        try:   # single-buffer grid-constant operands (VMEM headroom, esp. v7x)
            return pl.BlockSpec(shape, idx, pipeline_mode=pl.Buffered(1))
        except Exception:
            return pl.BlockSpec(shape, idx)

    out4 = pl.pallas_call(
        _fused_deconv_bn_lrelu_kernel,
        out_shape=jax.ShapeDtypeStruct((NH, kH, W, KWC), out_dtype),
        grid_spec=pltpu.PrefetchScalarGridSpec(
            num_scalar_prefetch=0,
            grid=grid,
            in_specs=[pl.BlockSpec((tm_eff, Cin), lambda i: (i, 0)),
                      _resident((Cin, C4)),
                      _resident((1, C4)),
                      _resident((1, C4))],
            out_specs=pl.BlockSpec((R, kH, W, KWC), lambda i: (i, 0, 0, 0))),
        compiler_params=pltpu.CompilerParams(
            dimension_semantics=("parallel",),
            vmem_limit_bytes=vmem_limit),
    )(x_flat, w_mat, scale, shift)

    # Pure-metadata reshape: element [n*H+h, kh, w, kw*Cout+c] is output pixel
    # (n, 2h+kh, 2w+kw, c) -> (N, 2H, 2W, Cout) with no transpose and no slice.
    return out4.reshape(N, H * kH, W * kW, Cout)


def deconv_block_forward(x_nchw, weight, bias, gamma, beta, **kwargs):
    """NCHW (PyTorch-layout) wrapper around the NHWC-native block."""
    x_nhwc = jnp.transpose(x_nchw, (0, 2, 3, 1))
    out = deconv_block_nhwc(x_nhwc, weight, bias, gamma, beta, **kwargs)
    return jnp.transpose(out, (0, 3, 1, 2))                          # (N, Cout, 2H, 2W)


# ---------------- Pure-JAX reference (for correctness check) ----------------

def reference_forward(x, weight, bias, gamma, beta):
    N, Cin, H, W = x.shape
    Cout, kH, kW = weight.shape[1], weight.shape[2], weight.shape[3]
    y = jnp.einsum('nihw,iokl->nohkwl', x.astype(jnp.float32), weight.astype(jnp.float32))
    y = y.reshape(N, Cout, H * kH, W * kW) + bias.astype(jnp.float32)[None, :, None, None]
    mean = jnp.mean(y, axis=(0, 2, 3), keepdims=True)
    var = jnp.mean((y - mean) ** 2, axis=(0, 2, 3), keepdims=True)
    yn = (y - mean) * lax.rsqrt(var + EPS)
    yn = yn * gamma[None, :, None, None] + beta[None, :, None, None]
    return jnp.where(yn >= 0, yn, NEG_SLOPE * yn)


if __name__ == "__main__":
    key = jax.random.PRNGKey(0)
    k_x, k_w, k_b, k_g, k_be = jax.random.split(key, 5)

    # Small shapes consistent with an InversionNet decoder stage.  Cout = 64 makes the
    # de-interleaved output slabs kW*Cout = 128 lanes wide (unmasked stores); the real
    # InversionNet widths (64/128/256/512) satisfy this too.
    N, Cin, H, W = 2, 16, 16, 16
    Cout, kH, kW = 64, 2, 2

    x = jax.random.normal(k_x, (N, Cin, H, W), dtype=jnp.float32)
    weight = 0.1 * jax.random.normal(k_w, (Cin, Cout, kH, kW), dtype=jnp.float32)
    bias = 0.1 * jax.random.normal(k_b, (Cout,), dtype=jnp.float32)
    gamma = 1.0 + 0.1 * jax.random.normal(k_g, (Cout,), dtype=jnp.float32)
    beta = 0.1 * jax.random.normal(k_be, (Cout,), dtype=jnp.float32)

    ref = jax.block_until_ready(reference_forward(x, weight, bias, gamma, beta))

    # f32 compute / f32 output path (testing only): tight check of the analytic-BN
    # formulation and of the in-kernel de-interleave.
    out_f32 = jax.block_until_ready(
        deconv_block_forward(x, weight, bias, gamma, beta,
                             compute_dtype=jnp.float32, out_dtype=jnp.float32))
    assert out_f32.shape == (N, Cout, H * kH, W * kW), out_f32.shape
    assert jnp.allclose(out_f32, ref, atol=5e-3, rtol=5e-3), \
        float(jnp.max(jnp.abs(out_f32 - ref)))

    # bf16-in / bf16-out production path: tolerance covers bf16 rounding of x, W and of
    # the stored activation (BN scale/shift are derived from the same quantized inputs).
    out_bf16 = jax.block_until_ready(
        deconv_block_forward(x, weight, bias, gamma, beta, compute_dtype=jnp.bfloat16))
    assert out_bf16.shape == (N, Cout, H * kH, W * kW), out_bf16.shape
    assert out_bf16.dtype == jnp.bfloat16, out_bf16.dtype
    assert jnp.allclose(out_bf16.astype(jnp.float32), ref, atol=4e-2, rtol=4e-2), \
        float(jnp.max(jnp.abs(out_bf16.astype(jnp.float32) - ref)))

    print("KERNEL_OK")
</pallas_src>

<mosaic_0001>
module attributes {stable_mosaic.version = 11 : i64} {
  func.func @_gram_partial_kernel(%arg0: i32, %arg1: memref<256x16xf32, #tpu.memory_space<vmem>>, %arg2: memref<1x16x16xf32, #tpu.memory_space<vmem>>, %arg3: memref<1x1x16xf32, #tpu.memory_space<vmem>>) attributes {dimension_semantics = [#tpu.dimension_semantics<parallel>], iteration_bounds = array<i64: 2>, scalar_prefetch = 0 : i64, scratch_operands = 0 : i64, tpu.core_type = #tpu.core_type<tc>, window_params = [{transform_indices = @transform_0, window_bounds = array<i64: 256, 16>}, {transform_indices = @transform_1, window_bounds = array<i64: 1, 16, 16>}, {transform_indices = @transform_2, window_bounds = array<i64: 1, 1, 16>}]} {
    %c0 = arith.constant 0 : index
    %c0_0 = arith.constant 0 : index
    %0 = vector.load %arg1[%c0, %c0_0] : memref<256x16xf32, #tpu.memory_space<vmem>>, vector<256x16xf32>
    %cst = arith.constant dense<0.000000e+00> : vector<16x16xf32>
    %1 = tpu.matmul %0, %0, %cst {dimension_numbers = #tpu.dot_dimension_numbers<[0], [0], [1], [1], [0, 1, 1, 1], [], []>} : vector<256x16xf32>, vector<256x16xf32>, vector<16x16xf32> -> vector<16x16xf32>
    %2 = vector.shape_cast %1 : vector<16x16xf32> to vector<1x16x16xf32>
    %c0_1 = arith.constant 0 : index
    %c0_2 = arith.constant 0 : index
    %c0_3 = arith.constant 0 : index
    %3 = vector.load %arg2[%c0_1, %c0_2, %c0_3] : memref<1x16x16xf32, #tpu.memory_space<vmem>>, vector<1x16x16xf32>
    tpu.vector_store %arg2[%c0_1, %c0_2, %c0_3], %2 {strides = array<i32>} : memref<1x16x16xf32, #tpu.memory_space<vmem>>, vector<1x16x16xf32>,
    %cst_4 = arith.constant dense<0.000000e+00> : vector<16xf32>
    %4 = vector.multi_reduction <add>, %0, %cst_4 [0] : vector<256x16xf32> to vector<16xf32>
    %5 = vector.shape_cast %4 : vector<16xf32> to vector<1x16xf32>
    %6 = vector.shape_cast %5 : vector<1x16xf32> to vector<1x1x16xf32>
    %c0_5 = arith.constant 0 : index
    %c0_6 = arith.constant 0 : index
    %c0_7 = arith.constant 0 : index
    %7 = vector.load %arg3[%c0_5, %c0_6, %c0_7] : memref<1x1x16xf32, #tpu.memory_space<vmem>>, vector<1x1x16xf32>
    tpu.vector_store %arg3[%c0_5, %c0_6, %c0_7], %6 {strides = array<i32>} : memref<1x1x16xf32, #tpu.memory_space<vmem>>, vector<1x1x16xf32>,
    return
  }
  func.func @transform_0(%arg0: i32) -> (i32, i32) {
    %c0_i32 = arith.constant 0 : i32
    %c0_i32_0 = arith.constant 0 : i32
    return %arg0, %c0_i32 : i32, i32
  }
  func.func @transform_1(%arg0: i32) -> (i32, i32, i32) {
    %c0_i32 = arith.constant 0 : i32
    %c0_i32_0 = arith.constant 0 : i32
    %c0_i32_1 = arith.constant 0 : i32
    return %arg0, %c0_i32, %c0_i32_0 : i32, i32, i32
  }
  func.func @transform_2(%arg0: i32) -> (i32, i32, i32) {
    %c0_i32 = arith.constant 0 : i32
    %c0_i32_0 = arith.constant 0 : i32
    %c0_i32_1 = arith.constant 0 : i32
    return %arg0, %c0_i32, %c0_i32_0 : i32, i32, i32
  }
}

</mosaic_0001>

<bundles_post_ra>
// kernel: tpu_custom_call.1
= control target key start
LH: loop header
LB: loop body
LE: loop exit
PB: predicated region body
PF: predicated region fallthrough
CT: control target
= control target key end

     0   :  { %8 = vsyncpa [#allocation3], 0  ;;  %s1185_s0 = inlined_call_operand.vmem [shape: f32[512,16], index: 0, kind: input, shape index: {}]   ;;  %s1186_s1 = inlined_call_operand.hbm [shape: f32[2,16,16], index: 1, kind: output, shape index: {0}]   ;;  %s1187_s2 = inlined_call_operand.hbm [shape: f32[2,1,16], index: 2, kind: output, shape index: {1}]  }
   0x1   :  { %10 = vsyncpa [#allocation3 + $0x1], 0 }
   0x2   :  { %11 = vsyncpa [#allocation5], 0 }
   0x3   :  { %13 = vsyncpa [#allocation5 + $0x1], 0  ;;  %s803_s9 = smov 0   ;;  %s805_s10 = smov 0  }
   0x4   :  { %s807_s11 = smov 0   ;;  %s809_s12 = smov 0  }
   0x5 LB: > { %s824_s13 = sadd.s32 4294967295, %s782_s12   ;;  %s520_s14 = sadd.s32 4294967294, %s782_s12   ;;  %s782_s12 = sphi %s809_s12, %s1193_s12   ;;  %s778_s11 = sphi %s807_s11, %s1192_s11   ;;  %s774_s10 = sphi %s805_s10, %s1191_s10   ;;  %s770_s9 = sphi %s803_s9, %s1190_s9  }
   0x6   : > { %s828_s15 = sadd.s32 1, %s782_s12   ;;  %s52_s16 = sadd.s32 1, %s778_s11 }
   0x7   : > { %s49_s17 = ssub.s32 %s782_s12, %s828_s15  ;;  %p62_p0 = scmp.ne.s32.totalorder %s778_s11, %s774_s10 }
   0x8   : > { %p50_p1 = scmp.eq.s32.totalorder %s49_s17, 0  ;;  %p63_p2 = scmp.eq.s32.totalorder %s824_s13, 1 }
   0x9   : > { %p68_p3 = scmp.ne.s32.totalorder %s774_s10, %s770_s9  ;;  %p69_p4 = scmp.eq.s32.totalorder %s520_s14, 1 }
   0xa   : > { %s839_s18 = scalar_select %p50_p1, %s778_s11, %s52_s16  }
   0xb   : > { %p841_p5 = por %p63_p2, %p62_p0  ;;  %p845_p6 = por %p69_p4, %p68_p3 }
   0xc   : > { %p523_p7 = scmp.ge.s32.totalorder %s782_s12, 1  ;;  %p122_p8 = scmp.lt.s32.totalorder %s782_s12, 3 }
   0xe   : > { %p123_p9 = pnand %p523_p7, %p122_p8 }
   0xf   : > { %s525_s21 = sshll.u32 (!%p123_p9), %s824_s13, 5  ;;  %s1114_s26 = sand.u32 (!%p123_p9), 1, %s774_s10  }
  0x10   : > { %126 = sbr.rel (%p123_p9) target bundleno = 371 (0x173), region = 24  ;;  %p149_p10 = scmp.lt.s32.totalorder (!%p123_p9), %s525_s21, 63 }
  0x11   : > { %s530_s27 = sshll.u32 (!%p123_p9), %s824_s13, 4  ;;  %s147_s28 = scalar_lea.vmem (!%p123_p9), [#allocation4], %s1114_s26 }
  0x12   : > { %s431_s3 = scalar_lea.hbm (!%p123_p9), %s1187_s2, %s530_s27  ;;  %s433_s4 = sshll.u32 (!%p123_p9), %s147_s28, 4  ;;  %s434_s4 = int_to_ptr.vmem [resolvable:$true] %s433_s4 }
  0x13   : > { %s405_s5 = scalar_lea.sflag (!%p123_p9), [#allocation5], %s1114_s26  ;;  %s692_s6 = scalar_lea.vmem (!%p123_p9), %s434_s4, 16 }
  0x14   : > { %p693_p11 = scmp.ne.s32.totalorder (!%p123_p9), %s434_s4, %s692_s6  ;;  %s784_s7 = smov (!%p123_p9), [#allocation4]  }
  0x15   : > { %s1195_s21 = smov (!%p149_p10, %s525_s21), 63  ;;  %vm325_vm0 = vcmask 130048   ;;  %vm397_vm1 = vcmask 122880   ;;  %s696_s8 = sshll.u32 %s784_s7, 4  ;;  %s697_s8 = int_to_ptr.vmem [resolvable:$false] %s696_s8 }
  0x16   : > { %s526_s22 = sshll.u32 %s1195_s21, 3  ;;  %p694_p12 = pnand %p693_p11, %p841_p5 }
  0x17   : > { %s855_s25 = scalar_lea.vmem %s1185_s0, %s526_s22  ;;  %s698_s14 = scalar_lea.vmem %s697_s8, 32 }
  0x18   : > { %v858_v0 = vld [vmem:[%s855_s25] sm:$0xff]  ;;  %v864_v2 = vld [vmem:[%s855_s25 + $0x8] sm:$0xff]  ;;  %v876_v8 = vld [vmem:[%s855_s25 + $0x10] sm:$0xff]  ;;  %p695_p13 = pneg %p694_p12  ;;  %p699_p0 = scmp.lt.s32.totalorder %s434_s4, %s697_s8 }
  0x19   : > { %v861_v1 = vld [vmem:[%s855_s25 + $0x80] sm:$0xff]  ;;  %v328_v4 = vsel %vm325_vm0, %v858_v0, 0.0  ;;  %v871_v5 = vld [vmem:[%s855_s25 + $0x88] sm:$0xff]  ;;  %v329_v6 = vsel %vm325_vm0, %v864_v2, 0.0  ;;  %v331_v10 = vsel %vm325_vm0, %v876_v8, 0.0  ;;  %v883_v11 = vld [vmem:[%s855_s25 + $0x18] sm:$0xff]  ;;  %p700_p1 = scmp.lt.s32.totalorder %s698_s14, %s692_s6 }
  0x1a   : > { %v650_v3 = vpack.i.bf16 %v858_v0, %v861_v1  ;;  %v330_v7 = vadd.f32 %v329_v6, %v328_v4  ;;  %v652_v9 = vpack.i.bf16 %v864_v2, %v871_v5  ;;  %v886_v12 = vld [vmem:[%s855_s25 + $0x90] sm:$0xff]  ;;  %v333_v14 = vsel %vm325_vm0, %v883_v11, 0.0  ;;  %v891_v15 = vld [vmem:[%s855_s25 + $0x20] sm:$0xff]  ;;  %v896_v18 = vld [vmem:[%s855_s25 + $0x28] sm:$0xff] }
  0x1b   : > { %v335_v16 = vsel %vm325_vm0, %v891_v15, 0.0  ;;  %v654_v19 = vpack.i.bf16 %v876_v8, %v886_v12  ;;  %v337_v20 = vsel %vm325_vm0, %v896_v18, 0.0  ;;  %v903_v21 = vld [vmem:[%s855_s25 + $0x98] sm:$0xff]  ;;  %v906_v23 = vld [vmem:[%s855_s25 + $0x30] sm:$0xff]  ;;  %v925_v31 = vld [vmem:[%s855_s25 + $0xa0] sm:$0xff]  ;;  %p701_p2 = por %p700_p1, %p699_p0 }
  0x1c   : > { %651 = vxpose.xlu0.b32.start [1/16] (narrow) %v650_v3, 16  ;;  %v332_v13 = vadd.f32 %v331_v10, %v330_v7  ;;  %v339_v24 = vsel %vm325_vm0, %v906_v23, 0.0  ;;  %v911_v26 = vld [vmem:[%s855_s25 + $0x38] sm:$0xff]  ;;  %v656_v28 = vpack.i.bf16 %v883_v11, %v903_v21  ;;  %v928_v33 = vld [vmem:[%s855_s25 + $0x40] sm:$0xff]  ;;  %v931_v34 = vld [vmem:[%s855_s25 + $0xf0] sm:$0xff]  ;;  %v658_v40 = vpack.i.bf16 %v891_v15, %v925_v31 }
  0x1d   : > { %v914_v27 = vld [vmem:[%s855_s25 + $0xf8] sm:$0xff]  ;;  %v341_v29 = vsel %vm325_vm0, %v911_v26, 0.0  ;;  %v343_v35 = vsel %vm325_vm0, %v928_v33, 0.0  ;;  %v938_v36 = vld [vmem:[%s855_s25 + $0x70] sm:$0xff]  ;;  %v943_v38 = vld [vmem:[%s855_s25 + $0x48] sm:$0xff]  ;;  %p702_p3 = pnand %p701_p2, %p695_p13 }
  0x1e   : > { %v334_v17 = vadd.f32 %v333_v14, %v332_v13  ;;  %v921_v30 = vld [vmem:[%s855_s25 + $0x78] sm:$0xff]  ;;  %534 = vmatprep.subr.mxu0 %v914_v27  ;;  %572 = vmatprep.subr.mxu1 %v914_v27  ;;  %v946_v39 = vld [vmem:[%s855_s25 + $0xe8] sm:$0xff]  ;;  %v345_v41 = vsel %vm325_vm0, %v943_v38, 0.0  ;;  %v962_v45 = vld [vmem:[%s855_s25 + $0x50] sm:$0xff]  ;;  %v355_v4 = vsel %vm325_vm0, %v938_v36, 0.0  ;;  %v359_v13 = vsel %vm325_vm0, %v861_v1, 0.0 }
  0x1f   : > { %535 = vmatpush3.msra.mxu0 %v921_v30  ;;  %588 = vmatpush3.msra.mxu1 %v921_v30  ;;  %v955_v42 = vld [vmem:[%s855_s25 + $0x68] sm:$0xff]  ;;  %v965_v46 = vld [vmem:[%s855_s25 + $0xe0] sm:$0xff]  ;;  %v347_v47 = vsel %vm325_vm0, %v962_v45, 0.0  ;;  %v977_v50 = vld [vmem:[%s855_s25 + $0x58] sm:$0xff] }
  0x20   : > { %653 = vxpose.xlu0.b32.cont [2/16] (narrow) %v652_v9, 16  ;;  %v336_v22 = vadd.f32 %v335_v16, %v334_v17  ;;  %536 = vmatprep.subr.mxu0 %v931_v34  ;;  %v959_v43 = vld [vmem:[%s855_s25 + $0xa8] sm:$0xff]  ;;  %v972_v48 = vld [vmem:[%s855_s25 + $0x60] sm:$0xff]  ;;  %v980_v51 = vld [vmem:[%s855_s25 + $0xd8] sm:$0xff]  ;;  %v349_v53 = vsel %vm325_vm0, %v977_v50, 0.0  ;;  %v353_v61 = vsel %vm325_vm0, %v955_v42, 0.0 }
  0x21   : > { %537 = vmatpush3.msra.mxu0 %v938_v36  ;;  %573 = vmatprep.subr.mxu1 %v931_v34  ;;  %v660_v52 = vpack.i.bf16 %v896_v18, %v959_v43  ;;  %v990_v54 = vld [vmem:[%s855_s25 + $0xb0] sm:$0xff]  ;;  %v351_v57 = vsel %vm325_vm0, %v972_v48, 0.0  ;;  %v1002_v58 = vld [vmem:[%s855_s25 + $0xc8] sm:$0xff]  ;;  %v1012_v62 = vld [vmem:[%s855_s25 + $0xb8] sm:$0xff]  ;;  %v357_v9 = vsel %vm325_vm0, %v921_v30, 0.0  ;;  %v361_v16 = vsel %vm325_vm0, %v871_v5, 0.0 }
  0x22   : > { %v338_v25 = vadd.f32 %v337_v20, %v336_v22  ;;  %538 = vmatprep.subr.mxu0 %v946_v39  ;;  %589 = vmatpush3.msra.mxu1 %v938_v36  ;;  %v993_v55 = vld [vmem:[%s855_s25 + $0xd0] sm:$0xff]  ;;  %v662_v60 = vpack.i.bf16 %v906_v23, %v990_v54  ;;  %v1015_v63 = vld [vmem:[%s855_s25 + $0xc0] sm:$0xff]  ;;  %v664_v7 = vpack.i.bf16 %v911_v26, %v1012_v62  ;;  %v363_v20 = vsel %vm325_vm0, %v886_v12, 0.0 }
  0x23   : > { %539 = vmatpush3.msra.mxu0 %v955_v42  ;;  %574 = vmatprep.subr.mxu1 %v946_v39  ;;  %v666_v17 = vpack.i.bf16 %v928_v33, %v1015_v63 }
  0x24   : > { %655 = vxpose.xlu0.b32.cont [3/16] (narrow) %v654_v19, 16  ;;  %v340_v32 = vadd.f32 %v339_v24, %v338_v25  ;;  %540 = vmatprep.subr.mxu0 %v965_v46  ;;  %v365_v24 = vsel %vm325_vm0, %v903_v21, 0.0  ;;  %v668_v25 = vpack.i.bf16 %v943_v38, %v1002_v58 }
  0x25   : > { %541 = vmatpush3.msra.mxu0 %v972_v48  ;;  %590 = vmatpush3.msra.mxu1 %v955_v42 }
  0x26   : > { %v342_v37 = vadd.f32 %v341_v29, %v340_v32  ;;  %542 = vmatprep.subr.mxu0 %v980_v51  ;;  %575 = vmatprep.subr.mxu1 %v965_v46  ;;  %v670_v32 = vpack.i.bf16 %v962_v45, %v993_v55 }
  0x27   : > { %543 = vmatpush3.msra.mxu0 %v977_v50  ;;  %591 = vmatpush3.msra.mxu1 %v972_v48 }
  0x28   : > { %657 = vxpose.xlu0.b32.cont [4/16] (narrow) %v656_v28, 16  ;;  %v344_v44 = vadd.f32 %v343_v35, %v342_v37  ;;  %544 = vmatprep.subr.mxu0 %v993_v55  ;;  %v373_v35 = vsel %vm325_vm0, %v1012_v62, 0.0 }
  0x29   : > { %545 = vmatpush3.msra.mxu0 %v962_v45  ;;  %576 = vmatprep.subr.mxu1 %v980_v51 }
  0x2a   : > { %v346_v49 = vadd.f32 %v345_v41, %v344_v44  ;;  %546 = vmatprep.subr.mxu0 %v1002_v58  ;;  %592 = vmatpush3.msra.mxu1 %v977_v50  ;;  %v383_v44 = vsel %vm325_vm0, %v965_v46, 0.0 }
  0x2b   : > { %547 = vmatpush3.msra.mxu0 %v943_v38  ;;  %577 = vmatprep.subr.mxu1 %v993_v55 }
  0x2c   : > { %659 = vxpose.xlu0.b32.cont [5/16] (narrow) %v658_v40, 16  ;;  %v348_v56 = vadd.f32 %v347_v47, %v346_v49  ;;  %548 = vmatprep.subr.mxu0 %v1015_v63  ;;  %v379_v40 = vsel %vm325_vm0, %v993_v55, 0.0 }
  0x2d   : > { %593 = vmatpush3.msra.mxu1 %v962_v45  ;;  %549 = vmatpush3.msra.mxu0 %v928_v33 }
  0x2e   : > { %v350_v59 = vadd.f32 %v349_v53, %v348_v56  ;;  %578 = vmatprep.subr.mxu1 %v1002_v58  ;;  %550 = vmatprep.subr.mxu0 %v1012_v62 }
  0x2f   : > { %594 = vmatpush3.msra.mxu1 %v943_v38  ;;  %551 = vmatpush3.msra.mxu0 %v911_v26  ;;  %v377_v38 = vsel %vm325_vm0, %v1002_v58, 0.0 }
  0x30   : > { %661 = vxpose.xlu0.b32.cont [6/16] (narrow) %v660_v52, 16  ;;  %v352_v3 = vadd.f32 %v351_v57, %v350_v59  ;;  %579 = vmatprep.subr.mxu1 %v1015_v63 }
  0x31   : > { %552 = vmatprep.subr.mxu0 %v990_v54  ;;  %595 = vmatpush3.msra.mxu1 %v928_v33 }
  0x32   : > { %v354_v6 = vadd.f32 %v353_v61, %v352_v3  ;;  %553 = vmatpush3.msra.mxu0 %v906_v23  ;;  %580 = vmatprep.subr.mxu1 %v1012_v62 }
  0x33   : > { %554 = vmatprep.subr.mxu0 %v959_v43  ;;  %596 = vmatpush3.msra.mxu1 %v911_v26  ;;  %v367_v26 = vsel %vm325_vm0, %v925_v31, 0.0 }
  0x34   : > { %663 = vxpose.xlu0.b32.cont [7/16] (narrow) %v662_v60, 16  ;;  %v356_v10 = vadd.f32 %v355_v4, %v354_v6  ;;  %555 = vmatpush3.msra.mxu0 %v896_v18 }
  0x35   : > { %581 = vmatprep.subr.mxu1 %v990_v54  ;;  %556 = vmatprep.subr.mxu0 %v925_v31 }
  0x36   : > { %v358_v14 = vadd.f32 %v357_v9, %v356_v10  ;;  %597 = vmatpush3.msra.mxu1 %v906_v23  ;;  %557 = vmatpush3.msra.mxu0 %v891_v15  ;;  %v369_v23 = vsel %vm325_vm0, %v959_v43, 0.0 }
  0x37   : > { %582 = vmatprep.subr.mxu1 %v959_v43  ;;  %558 = vmatprep.subr.mxu0 %v903_v21 }
  0x38   : > { %665 = vxpose.xlu0.b32.cont [8/16] (narrow) %v664_v7, 16  ;;  %v360_v19 = vadd.f32 %v359_v13, %v358_v14  ;;  %598 = vmatpush3.msra.mxu1 %v896_v18  ;;  %v371_v18 = vsel %vm325_vm0, %v990_v54, 0.0 }
  0x39   : > { %559 = vmatpush3.msra.mxu0 %v883_v11  ;;  %583 = vmatprep.subr.mxu1 %v925_v31 }
  0x3a   : > { %v362_v22 = vadd.f32 %v361_v16, %v360_v19  ;;  %560 = vmatprep.subr.mxu0 %v886_v12  ;;  %599 = vmatpush3.msra.mxu1 %v891_v15  ;;  %v672_v15 = vpack.i.bf16 %v977_v50, %v980_v51 }
  0x3b   : > { %561 = vmatpush3.msra.mxu0 %v876_v8  ;;  %584 = vmatprep.subr.mxu1 %v903_v21  ;;  %v375_v21 = vsel %vm325_vm0, %v1015_v63, 0.0 }
  0x3c   : > { %667 = vxpose.xlu0.b32.cont [9/16] (narrow) %v666_v17, 16  ;;  %v364_v28 = vadd.f32 %v363_v20, %v362_v22  ;;  %562 = vmatprep.subr.mxu0 %v871_v5 }
  0x3d   : > { %600 = vmatpush3.msra.mxu1 %v883_v11  ;;  %563 = vmatpush3.msra.mxu0 %v864_v2 }
  0x3e   : > { %v366_v29 = vadd.f32 %v365_v24, %v364_v28  ;;  %585 = vmatprep.subr.mxu1 %v886_v12  ;;  %564 = vmatprep.subr.mxu0 %v861_v1  ;;  %v674_v12 = vpack.i.bf16 %v972_v48, %v965_v46  ;;  %v387_v48 = vsel %vm325_vm0, %v931_v34, 0.0  ;;  %v680_v46 = vpack.i.bf16 %v921_v30, %v914_v27 }
  0x3f   : > { %601 = vmatpush3.msra.mxu1 %v876_v8  ;;  %565 = vmatpush3.msra.mxu0 %v858_v0 }
  0x40   : > { %669 = vxpose.xlu0.b32.cont [10/16] (narrow) %v668_v25, 16  ;;  %v368_v33 = vadd.f32 %v367_v26, %v366_v29  ;;  %586 = vmatprep.subr.mxu1 %v871_v5  ;;  %v381_v5 = vsel %vm325_vm0, %v980_v51, 0.0 }
  0x41   : > { %602 = vmatpush3.msra.mxu1 %v864_v2  ;;  %v676_v2 = vpack.i.bf16 %v955_v42, %v946_v39  ;;  %v389_v42 = vsel %vm325_vm0, %v914_v27, 0.0 }
  0x42   : > { %v370_v31 = vadd.f32 %v369_v23, %v368_v33  ;;  %587 = vmatprep.subr.mxu1 %v861_v1  ;;  %v385_v1 = vsel %vm325_vm0, %v946_v39, 0.0 }
  0x43   : > { %603 = vmatpush3.msra.mxu1 %v858_v0  ;;  %v678_v0 = vpack.i.bf16 %v938_v36, %v931_v34 }
  0x44   : > { %671 = vxpose.xlu0.b32.cont [11/16] (narrow) %v670_v32, 16  ;;  %v372_v37 = vadd.f32 %v371_v18, %v370_v31 }
  0x46   : > { %v374_v11 = vadd.f32 %v373_v35, %v372_v37 }
  0x48   : > { %673 = vxpose.xlu0.b32.cont [12/16] (narrow) %v672_v15, 16  ;;  %v376_v8 = vadd.f32 %v375_v21, %v374_v11 }
  0x4a   : > { %v378_v41 = vadd.f32 %v377_v38, %v376_v8 }
  0x4c   : > { %675 = vxpose.xlu0.b32.cont [13/16] (narrow) %v674_v12, 16  ;;  %v380_v43 = vadd.f32 %v379_v40, %v378_v41 }
  0x4e   : > { %v382_v45 = vadd.f32 %v381_v5, %v380_v43 }
  0x50   : > { %677 = vxpose.xlu0.b32.cont [14/16] (narrow) %v676_v2, 16  ;;  %v384_v47 = vadd.f32 %v383_v44, %v382_v45 }
  0x52   : > { %v386_v49 = vadd.f32 %v385_v1, %v384_v47 }
  0x54   : > { %679 = vxpose.xlu0.b32.cont [15/16] (narrow) %v678_v0, 16  ;;  %v388_v50 = vadd.f32 %v387_v48, %v386_v49 }
  0x56   : > { %v390_v51 = vadd.f32 %v389_v42, %v388_v50 }
  0x58   : > { %681 = vxpose.xlu0.b32.end [16/16] (narrow) %v680_v46, 16  ;;  %v391_v55 = vrot.slane %v390_v51, 4 }
  0x5a   : > { %v392_v56 = vadd.f32 %v391_v55, %v390_v51 }
  0x5c   : > { %v393_v57 = vrot.slane %v392_v56, 2 }
  0x5e   : > { %v394_v27 = vadd.f32 %v393_v57, %v392_v56 }
  0x60   : > { %v395_v30 = vrot.slane %v394_v27, 1 }
  0x62   : > { %v396_v58 = vadd.f32 %v395_v30, %v394_v27 }
  0x64   : > { %398 = vst.msk [vmem:[%s147_s28] sm:$0x1] %vm397_vm1, %v396_v58 }
  0x98   : > { %v682_v39 = vpop.trf.xlu0 }
  0x99   : > { %v683_v52 = vunpack.i.l.bf16 %v682_v39  ;;  %v686_v53 = vunpack.i.h.bf16 %v682_v39 }
  0x9b   : > { %314 = vmatprep.mubr.f32.mxu0 %v683_v52 }
  0x9c   : > { %v687_v36 = vpop.trf.xlu0  ;;  %315 = vmatmul.mubr.f32.vlgmr.msra.gmra.mxu0 %v686_v53 }
  0x9d   : > { %v691_v34 = vunpack.i.h.bf16 %v687_v36  ;;  %v688_v54 = vunpack.i.l.bf16 %v687_v36 }
  0x9f   : > { %319 = vmatprep.mubr.f32.mxu1 %v688_v54 }
  0xa0   : > { %320 = vmatmul.mubr.f32.vlgmr.msra.gmra.mxu1 %v691_v34 }
  0xa1   : > { %705 = shalt.err (!%p702_p3)
}
  0xa2   : > { %s706_s16 = scalar_lea.hbm %s431_s3, 16  ;;  %s710_s22 = scalar_lea.hbm %s1187_s2, 32 }
  0xa3   : > { %p707_p4 = scmp.ne.s32.totalorder %s431_s3, %s706_s16  ;;  %p711_p9 = scmp.lt.s32.totalorder %s431_s3, %s1187_s2 }
  0xa4   : > { %p712_p10 = scmp.lt.s32.totalorder %s710_s22, %s706_s16 }
  0xa5   : > { %p708_p7 = pnand %p707_p4, %p841_p5 }
  0xa6   : > { %p713_p11 = por %p712_p10, %p711_p9 }
  0xa7   : > { %p709_p8 = pneg %p708_p7 }
  0xa9   : > { %p714_p12 = pnand %p713_p11, %p709_p8 }
  0xab   : > { %717 = shalt.err (!%p714_p12)
}
  0xac   : > { %605 = dma.vmem_to_hbm [thread:$0]  (%p841_p5), %s434_s4, 16, %s431_s3, %s405_s5  }
  0xad   : > { %s524_s25 = sshll.u32 %s1114_s26, 4  ;;  %s533_s29 = sshll.u32 %s824_s13, 8 }
  0xae   : > { %s141_s27 = scalar_lea.vmem [#allocation2], %s524_s25  ;;  %s1142_s3 = scalar_lea.hbm %s1186_s1, %s533_s29 }
  0xaf   : > { %s417_s28 = sshll.u32 %s141_s27, 4  ;;  %s400_s4 = scalar_lea.sflag [#allocation3], %s1114_s26  ;;  %s1137_s28 = int_to_ptr.vmem [resolvable:$true] %s417_s28 }
  0xb0   : > { %s718_s5 = scalar_lea.vmem %s1137_s28, 256  ;;  %s785_s13 = smov [#allocation2]  }
  0xb1   : > { %p719_p13 = scmp.ne.s32.totalorder %s1137_s28, %s718_s5  ;;  %s722_s7 = sshll.u32 %s785_s13, 4  ;;  %s723_s7 = int_to_ptr.vmem [resolvable:$false] %s722_s7 }
  0xb2   : > { %s724_s8 = scalar_lea.vmem %s723_s7, 512  ;;  %p725_p2 = scmp.lt.s32.totalorder %s1137_s28, %s723_s7 }
  0xb3   : > { %p720_p0 = pnand %p719_p13, %p841_p5  ;;  %p726_p3 = scmp.lt.s32.totalorder %s724_s8, %s718_s5 }
  0xb5   : > { %p721_p1 = pneg %p720_p0  ;;  %p727_p4 = por %p726_p3, %p725_p2 }
  0xb7   : > { %p728_p7 = pnand %p727_p4, %p721_p1 }
 0x15c   : > { %v566_v59 = vpop.f32.mrf.mxu0 }
 0x15e   : > { %v567_v60 = vpop.f32.mrf.mxu0 }
 0x15f   : > { %v568_v61 = vadd.f32 %v567_v60, %v566_v59 }
 0x160   : > { %v569_v62 = vpop.f32.mrf.mxu1 }
 0x161   : > { %326 = vst.msk [vmem:[%s141_s27] sm:$0xff] %vm325_vm0, %v568_v61 }
 0x162   : > { %v570_v63 = vpop.f32.mrf.mxu1 }
 0x163   : > { %v571_v3 = vadd.f32 %v570_v63, %v569_v62 }
 0x165   : > { %327 = vst.msk [vmem:[%s141_s27 + $0x8] sm:$0xff] %vm325_vm0, %v571_v3 }
 0x166   : > { %731 = shalt.err (!%p728_p7)
}
 0x167   : > { %s732_s14 = scalar_lea.hbm %s1142_s3, 256  ;;  %s736_s21 = scalar_lea.hbm %s1186_s1, 512 }
 0x168   : > { %p733_p8 = scmp.ne.s32.totalorder %s1142_s3, %s732_s14  ;;  %p737_p11 = scmp.lt.s32.totalorder %s1142_s3, %s1186_s1 }
 0x169   : > { %p738_p12 = scmp.lt.s32.totalorder %s736_s21, %s732_s14 }
 0x16a   : > { %p734_p9 = pnand %p733_p8, %p841_p5 }
 0x16b   : > { %p739_p13 = por %p738_p12, %p737_p11 }
 0x16c   : > { %p735_p10 = pneg %p734_p9 }
 0x16e   : > { %p740_p0 = pnand %p739_p13, %p735_p10 }
 0x170   : > { %743 = shalt.err (!%p740_p0)
}
 0x171   : > { %s786_s24 = smov 128   ;;  %s787_s25 = smov 8  }
 0x172   : > { %604 = dma.vmem_to_hbm [thread:$0]  (%p841_p5), %s1137_s28, 256, %s1142_s3, %s400_s4, %s786_s24, %s786_s24, %s787_s25  }
 0x173 PF: > { %p615_p1 = scmp.ge.s32.totalorder %s782_s12, 2  ;;  %s445_s27 = sand.u32 1, %s770_s9  }
 0x174   : > { %s446_s29 = scalar_lea.sflag [#allocation3], %s445_s27 }
 0x175   : > { %p609_p2 = pnand %p615_p1, %p845_p6 }
 0x177   : > { %p610_p3 = pneg %p609_p2 }
 0x179   : > { %761 = dma.done.wait (%p610_p3), %s446_s29, 256  }
 0x17a   : > { %763 = vsyncadd (%p610_p3), %s446_s29, 4294967040  ;;  %s455_s30 = scalar_lea.sflag [#allocation5], %s445_s27 }
 0x17b   : > { %765 = dma.done.wait (%p610_p3), %s455_s30, 16  }
 0x17c   : > { %767 = vsyncadd (%p610_p3), %s455_s30, 4294967280  ;;  %p16_p5 = scmp.ge.s32.totalorder %s828_s15, 4   ;;  %s1190_s9 = smov %s774_s10 }
 0x17d   : > { %s1191_s10 = smov %s778_s11  ;;  %s1192_s11 = smov %s839_s18 }
 0x17e   : > { %s1193_s12 = smov %s828_s15  ;;  %18 = sbr.rel (!%p16_p5) target bundleno = 5 (0x5), region = 76 }
 0x183   :  { %459 = vsyncpa [#allocation3], 1 }
 0x184   :  { %461 = vsyncpa [#allocation3 + $0x1], 1 }
 0x185   :  { %462 = vsyncpa [#allocation5], 1 }
 0x186   :  { %464 = vsyncpa [#allocation5 + $0x1], 1 }

</bundles_post_ra>
